<compile_context>
chip_gen: v7x
topology: tpu7x:2x2x1
jax: 0.10.0
libtpu: 0.0.40
codegen_flags: <defaults>
</compile_context>

<pallas_src>
import functools

import numpy as np
import jax
import jax.numpy as jnp
from jax.experimental import pallas as pl
from jax.experimental.pallas import tpu as pltpu


def _mean_dim0_kernel(x_ref, o_ref, acc_ref, *, n_rows, tile_n, inv_n):
    # grid = (num_m_tiles, num_n_tiles); reduction (N) axis is innermost.
    k = pl.program_id(1)
    last_k = pl.num_programs(1) - 1

    @pl.when(k == 0)
    def _init():
        acc_ref[...] = jnp.zeros_like(acc_ref)

    tn, tm = x_ref.shape
    acc_rows = acc_ref.shape[0]

    def _partial_sum(x):
        if acc_rows == 1:
            return jnp.sum(x, axis=0, keepdims=True)
        # Pure VPU vreg adds across sublane-tile groups (leading-axis reduce);
        # no cross-sublane (XLU) reduce in the hot loop.
        return jnp.sum(x.reshape(tn // acc_rows, acc_rows, tm), axis=0)

    def _accumulate(mask_tail):
        x = x_ref[...].astype(jnp.float32)
        if mask_tail:
            row = jax.lax.broadcasted_iota(jnp.int32, x.shape, 0) + k * tile_n
            x = jnp.where(row < n_rows, x, 0.0)
        acc_ref[...] += _partial_sum(x)

    if n_rows % tile_n != 0:
        # Only the last (partial) reduction tile pays for the row mask.
        @pl.when(k != last_k)
        def _():
            _accumulate(mask_tail=False)

        @pl.when(k == last_k)
        def _():
            _accumulate(mask_tail=True)
    else:
        _accumulate(mask_tail=False)

    @pl.when(k == last_k)
    def _epilogue():
        # Single cross-sublane reduce + 1/N scale, once per output tile.
        total = jnp.sum(acc_ref[...], axis=0, keepdims=True)
        o_ref[...] = (total * inv_n).astype(o_ref.dtype)


def _round_up(v, m):
    return ((v + m - 1) // m) * m


def _pick_pack_factor(n, m, *, min_lanes=512, max_lanes=4096):
    """Fold g consecutive reduction rows into the lane axis for skinny-M inputs."""
    if n <= 1 or m >= min_lanes:
        return 1
    best_small = None     # smallest divisor of n reaching min_lanes lanes
    best_any = 1          # largest divisor of n within max_lanes lanes
    for g in range(2, n + 1):
        if g * m > max_lanes:
            break
        if n % g == 0:
            best_any = g
            if best_small is None and g * m >= min_lanes:
                best_small = g
    return best_small if best_small is not None else best_any


def mean_dim0(x, *, tile_m=2048, tile_n=1024):
    """Equivalent of torch.mean(x, dim=0) for an NCHW (or any >=1D) input."""
    orig_shape = x.shape
    N = int(orig_shape[0])
    rest = tuple(orig_shape[1:])
    M = int(np.prod(rest)) if rest else 1

    inv_n = 1.0 / float(N)

    # Lane-packing for skinny-M inputs: (N, M) -> (N // g, g * M) gives wide,
    # lane-dense DMA rows and an unmasked-dense accumulator/output.
    g = _pick_pack_factor(N, M)
    n_rows = N // g
    m_cols = g * M
    x2 = x.reshape(n_rows, m_cols)

    # ---- lane (last-dim) tile ------------------------------------------------
    if m_cols % 128 == 0:
        tm = min(tile_m, m_cols)
    elif m_cols <= tile_m:
        tm = m_cols                    # full-extent last dim is exempt from the 128 rule
    else:
        tm = _round_up(tile_m, 128)    # multiple of 128; last tile partial, masked store

    # Guarantee >= 2 lane tiles when possible so ("parallel", ...) can use both
    # v7x TensorCores even when a single tile would cover all of M.
    if tm == m_cols and m_cols >= 256:
        half = _round_up(pl.cdiv(m_cols, 2), 128)
        if half < m_cols:
            tm = half

    # ---- reduction (sublane) tile ---------------------------------------------
    tn = min(tile_n, n_rows)
    if tn < n_rows and tn % 8 != 0:
        tn = max(8, (tn // 8) * 8)     # keep tiled reduction blocks sublane-aligned
        if tn >= n_rows:
            tn = n_rows

    acc_rows = 8 if (tn >= 8 and tn % 8 == 0) else 1

    num_m = pl.cdiv(m_cols, tm)
    num_n = pl.cdiv(n_rows, tn)

    in_isz = jnp.dtype(x.dtype).itemsize
    out_isz = in_isz
    # VMEM budget: double-buffered input block + possible f32 widening temp for
    # sub-32-bit inputs + double-buffered output row + accumulator + headroom.
    needed = (2 * tn * tm * in_isz
              + (tn * tm * 4 if in_isz < 4 else 0)
              + 2 * tm * out_isz
              + acc_rows * tm * 4)
    vmem_limit = int(min(max(needed + (4 << 20), 16 << 20), 48 << 20))

    kernel = functools.partial(
        _mean_dim0_kernel, n_rows=n_rows, tile_n=tn, inv_n=inv_n)

    out = pl.pallas_call(
        kernel,
        out_shape=jax.ShapeDtypeStruct((1, m_cols), x.dtype),
        grid=(num_m, num_n),
        in_specs=[pl.BlockSpec((tn, tm), lambda j, k: (k, j))],
        out_specs=pl.BlockSpec((1, tm), lambda j, k: (0, j)),
        scratch_shapes=[pltpu.VMEM((acc_rows, tm), jnp.float32)],
        compiler_params=pltpu.CompilerParams(
            dimension_semantics=("parallel", "arbitrary"),
            vmem_limit_bytes=vmem_limit),
        cost_estimate=pl.CostEstimate(
            flops=n_rows * m_cols,
            transcendentals=0,
            bytes_accessed=n_rows * m_cols * in_isz + m_cols * out_isz),
    )(x2)

    if g > 1:
        # Tiny g-fold of the packed partial means (g * M elements) outside the kernel.
        out = out.reshape(g, M).sum(axis=0)
    return out.reshape(rest)


if __name__ == "__main__":
    # prototype.__init__ defines no parameters; forward is a pure reduction over dim 0.
    key = jax.random.PRNGKey(0)
    x = jax.random.normal(key, (2, 4, 16, 16), dtype=jnp.float32)  # NCHW

    y = jax.block_until_ready(mean_dim0(x))
    y_ref = jnp.mean(x, axis=0)
    assert y.shape == y_ref.shape == (4, 16, 16)
    np.testing.assert_allclose(np.asarray(y), np.asarray(y_ref), rtol=1e-6, atol=1e-6)

    # Extra sanity: skinny M (135 lanes) exercises lane-packing + masked partial
    # lane tiles; no HBM padding is materialized.
    x2 = jax.random.normal(jax.random.PRNGKey(1), (20, 3, 5, 9), dtype=jnp.float32)
    y2 = jax.block_until_ready(mean_dim0(x2, tile_m=128, tile_n=8))
    np.testing.assert_allclose(
        np.asarray(y2), np.asarray(jnp.mean(x2, axis=0)), rtol=1e-5, atol=1e-5)

    print("KERNEL_OK")
</pallas_src>

<mosaic_0001>
module attributes {stable_mosaic.version = 11 : i64} {
  func.func @_mean_dim0_kernel(%arg0: i32, %arg1: i32, %arg2: memref<2x512xf32, #tpu.memory_space<vmem>>, %arg3: memref<1x512xf32, #tpu.memory_space<vmem>>, %arg4: memref<1x512xf32, #tpu.memory_space<vmem>>) attributes {dimension_semantics = [#tpu.dimension_semantics<parallel>, #tpu.dimension_semantics<arbitrary>], iteration_bounds = array<i64: 2, 1>, scalar_prefetch = 0 : i64, scratch_operands = 1 : i64, tpu.core_type = #tpu.core_type<tc>, window_params = [{transform_indices = @transform_0, window_bounds = array<i64: 2, 512>}, {transform_indices = @transform_1, window_bounds = array<i64: 1, 512>}]} {
    %c0_i32 = arith.constant 0 : i32
    %0 = arith.cmpi eq, %arg1, %c0_i32 : i32
    %1 = arith.extui %0 : i1 to i32
    %c0_i32_0 = arith.constant 0 : i32
    %2 = arith.cmpi ne, %1, %c0_i32_0 : i32
    scf.if %2 {
      %cst_8 = arith.constant 0.000000e+00 : f32
      %12 = vector.broadcast %cst_8 : f32 to vector<1x512xf32>
      %c0_9 = arith.constant 0 : index
      %c0_10 = arith.constant 0 : index
      %13 = vector.load %arg4[%c0_9, %c0_10] : memref<1x512xf32, #tpu.memory_space<vmem>>, vector<1x512xf32>
      tpu.vector_store %arg4[%c0_9, %c0_10], %12 {strides = array<i32>} : memref<1x512xf32, #tpu.memory_space<vmem>>, vector<1x512xf32>,
    } else {
    }
    %c0 = arith.constant 0 : index
    %c0_1 = arith.constant 0 : index
    %3 = vector.load %arg2[%c0, %c0_1] : memref<2x512xf32, #tpu.memory_space<vmem>>, vector<2x512xf32>
    %c0_2 = arith.constant 0 : index
    %c0_3 = arith.constant 0 : index
    %4 = vector.load %arg4[%c0_2, %c0_3] : memref<1x512xf32, #tpu.memory_space<vmem>>, vector<1x512xf32>
    %cst = arith.constant dense<0.000000e+00> : vector<512xf32>
    %5 = vector.multi_reduction <add>, %3, %cst [0] : vector<2x512xf32> to vector<512xf32>
    %6 = vector.shape_cast %5 : vector<512xf32> to vector<1x512xf32>
    %7 = arith.addf %4, %6 : vector<1x512xf32>
    %c0_4 = arith.constant 0 : index
    %c0_5 = arith.constant 0 : index
    %8 = vector.load %arg4[%c0_4, %c0_5] : memref<1x512xf32, #tpu.memory_space<vmem>>, vector<1x512xf32>
    tpu.vector_store %arg4[%c0_4, %c0_5], %7 {strides = array<i32>} : memref<1x512xf32, #tpu.memory_space<vmem>>, vector<1x512xf32>,
    %c0_i32_6 = arith.constant 0 : i32
    %9 = arith.cmpi eq, %arg1, %c0_i32_6 : i32
    %10 = arith.extui %9 : i1 to i32
    %c0_i32_7 = arith.constant 0 : i32
    %11 = arith.cmpi ne, %10, %c0_i32_7 : i32
    scf.if %11 {
      %c0_8 = arith.constant 0 : index
      %c0_9 = arith.constant 0 : index
      %12 = vector.load %arg4[%c0_8, %c0_9] : memref<1x512xf32, #tpu.memory_space<vmem>>, vector<1x512xf32>
      %cst_10 = arith.constant dense<0.000000e+00> : vector<512xf32>
      %13 = vector.multi_reduction <add>, %12, %cst_10 [0] : vector<1x512xf32> to vector<512xf32>
      %14 = vector.shape_cast %13 : vector<512xf32> to vector<1x512xf32>
      %cst_11 = arith.constant 5.000000e-01 : f32
      %15 = vector.broadcast %cst_11 : f32 to vector<1x512xf32>
      %16 = arith.mulf %14, %15 : vector<1x512xf32>
      %c0_12 = arith.constant 0 : index
      %c0_13 = arith.constant 0 : index
      %17 = vector.load %arg3[%c0_12, %c0_13] : memref<1x512xf32, #tpu.memory_space<vmem>>, vector<1x512xf32>
      tpu.vector_store %arg3[%c0_12, %c0_13], %16 {strides = array<i32>} : memref<1x512xf32, #tpu.memory_space<vmem>>, vector<1x512xf32>,
    } else {
    }
    return
  }
  func.func @transform_0(%arg0: i32, %arg1: i32) -> (i32, i32) {
    %c0_i32 = arith.constant 0 : i32
    return %arg1, %arg0 : i32, i32
  }
  func.func @transform_1(%arg0: i32, %arg1: i32) -> (i32, i32) {
    %c0_i32 = arith.constant 0 : i32
    %c0_i32_0 = arith.constant 0 : i32
    return %c0_i32, %arg0 : i32, i32
  }
}

</mosaic_0001>

<bundles_post_ra>
// kernel: tpu_custom_call.1
= control target key start
LH: loop header
LB: loop body
LE: loop exit
PB: predicated region body
PF: predicated region fallthrough
CT: control target
= control target key end

     0   :  { %6 = vsyncpa [#allocation4], 0  ;;  %s746_s0 = inlined_call_operand.hbm [shape: f32[2,1024], index: 0, kind: input, shape index: {}]   ;;  %s747_s1 = inlined_call_operand.hbm [shape: f32[1,1024], index: 1, kind: output, shape index: {}]  }
   0x1   :  { %8 = vsyncpa [#allocation4 + $0x1], 0 }
   0x2   :  { %9 = vsyncpa [#allocation5], 0 }
   0x3   :  { %11 = vsyncpa [#allocation5 + $0x1], 0  ;;  %s563_s6 = smov 0   ;;  %s565_s7 = smov 0  }
   0x4   :  { %s567_s8 = smov 0   ;;  %s569_s9 = smov 0  }
   0x5   :  { %s571_s10 = smov 0   ;;  %s573_s11 = smov 0  }
   0x6 LB: > { %s351_s12 = sadd.s32 4294967295, %s546_s11   ;;  %s352_s13 = sadd.s32 4294967294, %s546_s11   ;;  %s546_s11 = sphi %s573_s11, %s17_s11   ;;  %s542_s10 = sphi %s571_s10, %s765_s10   ;;  %s538_s9 = sphi %s569_s9, %s764_s9   ;;  %s534_s8 = sphi %s567_s8, %s763_s8   ;;  %s530_s7 = sphi %s565_s7, %s762_s7   ;;  %s526_s6 = sphi %s563_s6, %s761_s6  }
   0x7   : > { %s29_s14 = sadd.s32 1, %s542_s10  ;;  %s38_s15 = sadd.s32 1, %s534_s8 }
   0x8   : > { %p31_p0 = scmp.ge.s32.totalorder %s29_s14, 2  ;;  %p45_p1 = scmp.ne.s32.totalorder %s534_s8, %s530_s7 }
   0x9   : > { %p46_p2 = scmp.eq.s32.totalorder %s546_s11, 0  ;;  %p51_p3 = scmp.ne.s32.totalorder %s530_s7, %s526_s6 }
   0xa   : > { %s767_s14 = smov (%p31_p0, %s29_s14), 0  ;;  %p52_p5 = scmp.eq.s32.totalorder %s351_s12, 0 }
   0xb   : > { %p604_p4 = por %p46_p2, %p45_p1  ;;  %s34_s17 = ssub.s32 %s542_s10, %s767_s14 }
   0xc   : > { %p75_p6 = scmp.eq.s32.totalorder %s351_s12, 1  ;;  %p36_p7 = scmp.eq.s32.totalorder %s34_s17, 0 }
   0xd   : > { %p610_p8 = por %p52_p5, %p51_p3  ;;  %p81_p10 = scmp.eq.s32.totalorder %s352_s13, 1 }
   0xe   : > { %p614_p9 = por %p75_p6, %p45_p1  ;;  %p380_p13 = scmp.lt.s32.totalorder %s546_s11, 2 }
   0xf   : > { %s619_s20 = scalar_select %p36_p7, %s534_s8, %s38_s15  }
  0x10   : > { %s751_s19 = scalar_select %p614_p9, 1, 0 }
  0x11   : > { %p621_p11 = por %p81_p10, %p51_p3  ;;  %s101_s22 = sand.u32 1, %s534_s8  }
  0x12   : > { %s355_s23 = sshll.u32 %s101_s22, 3  ;;  %s366_s24 = sshll.u32 %s542_s10, 7 }
  0x13   : > { %s752_s21 = scalar_select %p621_p11, 1, 0 }
  0x14   : > { %s632_s27 = scalar_lea.hbm %s746_s0, %s366_s24  ;;  %s105_s28 = scalar_lea.vmem [#allocation3], %s355_s23 }
  0x15   : > { %s115_s29 = sshll.u32 %s105_s28, 4  ;;  %p638_p0 = pnand %p380_p13, %p604_p4  ;;  %s634_s29 = int_to_ptr.vmem [resolvable:$true] %s115_s29 }
  0x16   : > { %s102_s2 = scalar_lea.sflag [#allocation4], %s101_s22  ;;  %s434_s3 = scalar_lea.hbm %s632_s27, 128 }
  0x17   : > { %p435_p3 = scmp.ne.s32.totalorder %s632_s27, %s434_s3  ;;  %p436_p5 = pneg %p638_p0 }
  0x18   : > { %s439_s12 = scalar_lea.hbm %s746_s0, 256  ;;  %p440_p4 = scmp.lt.u32.totalorder %s632_s27, %s746_s0 }
  0x19   : > { %p437_p6 = pnand %p436_p5, %p435_p3  ;;  %p441_p10 = scmp.lt.u32.totalorder %s439_s12, %s434_s3 }
  0x1a   : > { %p443_p12 = scmp.lt.u32.totalorder %s434_s3, %s632_s27 }
  0x1b   : > { %p438_p7 = pneg %p437_p6  ;;  %p442_p13 = por %p441_p10, %p440_p4 }
  0x1d   : > { %p444_p1 = por %p443_p12, %p442_p13 }
  0x1f   : > { %p445_p2 = pnand %p444_p1, %p438_p7 }
  0x21   : > { %448 = shalt.err (!%p445_p2)
}
  0x22   : > { %s449_s16 = scalar_lea.vmem %s634_s29, 128  ;;  %s548_s17 = smov [#allocation3]  }
  0x23   : > { %p450_p3 = scmp.ne.s32.totalorder %s634_s29, %s449_s16  ;;  %s454_s22 = sshll.u32 %s548_s17, 4  ;;  %s455_s22 = int_to_ptr.vmem [resolvable:$false] %s454_s22 }
  0x24   : > { %s456_s23 = scalar_lea.vmem %s455_s22, 256  ;;  %p457_p9 = scmp.lt.s32.totalorder %s634_s29, %s455_s22 }
  0x25   : > { %p452_p6 = pnand %p450_p3, %p436_p5  ;;  %p458_p4 = scmp.lt.s32.totalorder %s456_s23, %s449_s16 }
  0x27   : > { %p453_p11 = pneg %p452_p6  ;;  %p459_p10 = por %p458_p4, %p457_p9 }
  0x29   : > { %p460_p12 = pnand %p459_p10, %p453_p11 }
  0x2b   : > { %463 = shalt.err (!%p460_p12)
}
  0x2c   : > { %375 = dma.hbm_to_vmem [thread:$0]  (!%p638_p0), %s632_s27, 128, %s634_s29, %s102_s2  }
  0x2d   : > { %p754_p1 = scmp.lt.s32.totalorder %s546_s11, 3  ;;  %p755_p2 = scmp.ge.s32.totalorder %s546_s11, 1 }
  0x2f   : > { %p121_p5 = pnand %p755_p2, %p754_p1 }
  0x30   : > { %s674_s24 = sand.u32 (!%p121_p5), 1, %s530_s7  }
  0x31   : > { %124 = sbr.rel (%p121_p5) target bundleno = 115 (0x73), region = 24  ;;  %s359_s25 = sshll.u32 (!%p121_p5), %s674_s24, 3 }
  0x32   : > { %s127_s26 = scalar_lea.sflag (!%p121_p5), [#allocation4], %s674_s24  ;;  %s130_s28 = scalar_lea.vmem (!%p121_p5), [#allocation3], %s359_s25 }
  0x38   : > { %517 = dma.done.wait (%p610_p8), %s127_s26, 128  }
  0x39   : > { %519 = vsyncadd (%p610_p8), %s127_s26, 4294967168  ;;  %v155_v0 = vlaneseq  ;;  %v549_v1 = vmov 1983009808   ;;  %v550_v5 = vmov 0.0   ;;  %v160_v8 = vld [vmem:[%s130_s28] sm:$0xff]  ;;  %vm184_vm1 = vcmask 1041408  }
  0x3a   : > { %v165_v2 = vunpack.c.l.s4 %v549_v1  ;;  %v163_v9 = vcombine.high %v160_v8, %v160_v8  ;;  %v551_v22 = vmov 1966171168   ;;  %s360_s18 = sshll.u32 %s674_s24, 2  ;;  %s367_s30 = sshll.u32 %s538_s9, 6 }
  0x3b   : > { %vm682_vm0 = vcmp.lt.s32.totalorder %v155_v0, 512  ;;  %v168_v4 = vshrl.u32 %v155_v0, 7  ;;  %v220_v23 = vunpack.c.l.s4 %v551_v22  ;;  %s148_s27 = scalar_lea.vmem [#allocation6], %s360_s18  ;;  %s697_s4 = scalar_lea.hbm %s747_s1, %s367_s30 }
  0x3c   : > { %159 = vst.msk [vmem:[#allocation2] sm:$0xf] %vm682_vm0, %v550_v5  ;;  %v166_v6 = vunpack.c.0.s8 %v165_v2  ;;  %s270_s29 = sshll.u32 %s148_s27, 4  ;;  %s256_s5 = scalar_lea.sflag [#allocation5], %s674_s24  ;;  %s692_s29 = int_to_ptr.vmem [resolvable:$true] %s270_s29 }
  0x3d   : > { %v221_v32 = vunpack.c.0.s8 %v220_v23  ;;  %s464_s12 = scalar_lea.vmem %s692_s29, 64  ;;  %p758_p9 = scmp.ne.s32.totalorder %s751_s19, 0 }
  0x3e   : > { %v169_v7 = vsub.s32 %v166_v6, %v168_v4  ;;  %p465_p8 = scmp.ne.s32.totalorder %s692_s29, %s464_s12  ;;  %s552_s9 = smov [#allocation6]  }
  0x3f   : > { %v224_v44 = vsub.s32 %v221_v32, %v168_v4  ;;  %s468_s13 = sshll.u32 %s552_s9, 4  ;;  %s469_s13 = int_to_ptr.vmem [resolvable:$false] %s468_s13 }
  0x40   : > { %v170_v10 = vrot.slane %v160_v8, %v169_v7  ;;  %v177_v11 = vrot.slane %v163_v9, %v169_v7  ;;  %p466_p11 = pnand %p465_p8, %p758_p9  ;;  %s470_s15 = scalar_lea.vmem %s469_s13, 128 }
  0x41   : > { %p471_p7 = scmp.lt.s32.totalorder %s692_s29, %s469_s13  ;;  %p472_p13 = scmp.lt.s32.totalorder %s470_s15, %s464_s12 }
  0x42   : > { %v178_v12 = vcombine.high %v170_v10, %v170_v10  ;;  %v185_v13 = vsel %vm184_vm1, %v170_v10, 0.0  ;;  %v179_v15 = vcombine.high %v177_v11, %v177_v11  ;;  %v199_v17 = vsel %vm184_vm1, %v177_v11, 0.0  ;;  %p467_p0 = pneg %p466_p11 }
  0x43   : > { %v186_v14 = vrot.slane %v185_v13, 4  ;;  %v200_v20 = vrot.slane %v199_v17, 4  ;;  %v161_v51 = vld [vmem:[#allocation2] sm:$0xf]  ;;  %p473_p3 = por %p472_p13, %p471_p7 }
  0x44   : > { %v192_v16 = vsel %vm184_vm1, %v178_v12, 0.0  ;;  %v206_v21 = vsel %vm184_vm1, %v179_v15, 0.0 }
  0x45   : > { %v187_v18 = vadd.f32 %v186_v14, %v185_v13  ;;  %v193_v19 = vrot.slane %v192_v16, 4  ;;  %v201_v26 = vadd.f32 %v200_v20, %v199_v17  ;;  %v207_v27 = vrot.slane %v206_v21, 4  ;;  %p474_p6 = pnand %p473_p3, %p467_p0 }
  0x47   : > { %v188_v24 = vrot.slane %v187_v18, 2  ;;  %v194_v25 = vadd.f32 %v193_v19, %v192_v16  ;;  %v202_v30 = vrot.slane %v201_v26, 2  ;;  %v208_v31 = vadd.f32 %v207_v27, %v206_v21 }
  0x49   : > { %v189_v28 = vadd.f32 %v188_v24, %v187_v18  ;;  %v195_v29 = vrot.slane %v194_v25, 2  ;;  %v203_v35 = vadd.f32 %v202_v30, %v201_v26  ;;  %v209_v36 = vrot.slane %v208_v31, 2 }
  0x4b   : > { %v190_v33 = vrot.slane %v189_v28, 1  ;;  %v196_v34 = vadd.f32 %v195_v29, %v194_v25  ;;  %v204_v39 = vrot.slane %v203_v35, 1  ;;  %v210_v40 = vadd.f32 %v209_v36, %v208_v31 }
  0x4d   : > { %v191_v37 = vadd.f32 %v190_v33, %v189_v28  ;;  %v197_v38 = vrot.slane %v196_v34, 1  ;;  %v205_v42 = vadd.f32 %v204_v39, %v203_v35  ;;  %v211_v43 = vrot.slane %v210_v40, 1 }
  0x4f   : > { %v198_v41 = vadd.f32 %v197_v38, %v196_v34  ;;  %v212_v45 = vadd.f32 %v211_v43, %v210_v40 }
  0x51   : > { %v217_v46 = vcombine.low %v191_v37, %v198_v41  ;;  %v218_v47 = vcombine.low %v205_v42, %v212_v45 }
  0x53   : > { %v225_v48 = vrot.slane %v217_v46, %v224_v44  ;;  %v232_v49 = vrot.slane %v218_v47, %v224_v44 }
  0x55   : > { %v233_v50 = vcombine.low %v225_v48, %v232_v49 }
  0x57   : > { %v240_v52 = vrot.slane %v233_v50, %v224_v44 }
  0x59   : > { %v242_v53 = vadd.f32 %v240_v52, %v161_v51 }
  0x5b   : > { %247 = vst.msk [vmem:[#allocation2] sm:$0xf] %vm682_vm0, %v242_v53 }
  0x62   : > { %v251_v54 = vld [vmem:[#allocation2] sm:$0xf] }
  0x63   : > { %v253_v55 = vmul.f32 0.5, %v251_v54 }
  0x65   : > { %254 = vst.msk [vmem:[%s148_s27] sm:$0xf] %vm682_vm0, %v253_v55 }
  0x66   : > { %477 = shalt.err (!%p474_p6)
}
  0x67   : > { %s478_s16 = scalar_lea.hbm %s697_s4, 64  ;;  %s482_s23 = scalar_lea.hbm %s747_s1, 128 }
  0x68   : > { %p479_p4 = scmp.ne.s32.totalorder %s697_s4, %s478_s16  ;;  %p483_p1 = scmp.lt.u32.totalorder %s697_s4, %s747_s1 }
  0x69   : > { %p484_p2 = scmp.lt.u32.totalorder %s482_s23, %s478_s16  ;;  %p486_p8 = scmp.lt.u32.totalorder %s478_s16, %s697_s4 }
  0x6a   : > { %p480_p10 = pnand %p479_p4, %p758_p9 }
  0x6b   : > { %p485_p5 = por %p484_p2, %p483_p1 }
  0x6c   : > { %p481_p12 = pneg %p480_p10 }
  0x6d   : > { %p487_p11 = por %p486_p8, %p485_p5 }
  0x6f   : > { %p488_p0 = pnand %p487_p11, %p481_p12 }
  0x71   : > { %491 = shalt.err (!%p488_p0)
}
  0x72   : > { %370 = dma.vmem_to_hbm [thread:$0]  (%p758_p9), %s692_s29, 64, %s697_s4, %s256_s5  }
  0x73 PF: > { %s282_s26 = sand.u32 1, %s526_s6   ;;  %p759_p7 = scmp.ne.s32.totalorder %s752_s21, 0 }
  0x74   : > { %p760_p13 = scmp.ge.s32.totalorder %s546_s11, 2  ;;  %s283_s28 = scalar_lea.sflag [#allocation5], %s282_s26 }
  0x76   : > { %p377_p3 = pnand %p760_p13, %p759_p7 }
  0x78   : > { %521 = dma.done.wait (!%p377_p3), %s283_s28, 64  }
  0x79   : > { %523 = vsyncadd (!%p377_p3), %s283_s28, 4294967232  ;;  %s17_s11 = sadd.s32 1, %s546_s11   ;;  %s761_s6 = smov %s530_s7 }
  0x7a   : > { %p14_p6 = scmp.ge.s32.totalorder %s17_s11, 4   ;;  %s762_s7 = smov %s534_s8 }
  0x7b   : > { %s763_s8 = smov %s619_s20  ;;  %s764_s9 = smov %s542_s10 }
  0x7c   : > { %s765_s10 = smov %s767_s14  ;;  %16 = sbr.rel (!%p14_p6) target bundleno = 6 (0x6), region = 77 }
  0x83   :  { %288 = vsyncpa [#allocation4], 1 }
  0x84   :  { %290 = vsyncpa [#allocation4 + $0x1], 1 }
  0x85   :  { %291 = vsyncpa [#allocation5], 1 }
  0x86   :  { %293 = vsyncpa [#allocation5 + $0x1], 1 }

</bundles_post_ra>
